<compile_context>
chip_gen: v5e
topology: v5e:2x2
jax: 0.10.0
libtpu: 0.0.40
codegen_flags: <defaults>
</compile_context>

<pallas_src>
import functools
import math

import jax
import jax.numpy as jnp
from jax.experimental import pallas as pl
from jax.experimental.pallas import tpu as pltpu

LANE = 128
MAX_TILE_E = 32768            # lane-width cap per streamed e tile
DIST_VMEM_BUDGET = 4 << 20    # bytes allowed for one [N, tile_e] f32 intermediate


def _round_up(x, m):
    return ((x + m - 1) // m) * m


def _cdiv(a, b):
    return -(-a // b)


def _tile_cap(n):
    # Keep N * tile_e * 4 bytes (the materialized distance tile) well under the
    # scoped VMEM limit on every generation (v7x has the smallest VMEM).
    cap = (DIST_VMEM_BUDGET // (4 * max(n, 1))) // LANE * LANE
    return max(LANE, min(MAX_TILE_E, cap))


# ----------------------------------------------------------------------------
# Deterministic spiral "parameter" generation (plain JAX glue; mirrors
# generate_spiral_data_torch but emits [2, E] directly so E lands on the lane
# axis).
# TODO(synk): noise is drawn from a fixed JAX PRNGKey instead of torch.randn,
# so the loss value will not bit-match the (itself nondeterministic) PyTorch
# reference.
# ----------------------------------------------------------------------------
def generate_spiral_data_t(points_per_class, num_classes, key):
    radius = jnp.linspace(0.0, 1.0, points_per_class)
    keys = jax.random.split(key, num_classes)
    cols = []
    for i in range(num_classes):
        noise = jax.random.normal(keys[i], (points_per_class,)) * 0.2
        theta = (
            jnp.linspace(
                i * 4.0 * math.pi / num_classes,
                (i + 1) * 4.0 * math.pi / num_classes,
                points_per_class,
            )
            + noise
        )
        x1 = radius * jnp.sin(theta)
        x2 = radius * jnp.cos(theta)
        cols.append(jnp.stack((x1, x2), axis=0))                  # [2, ppc]
    return jnp.concatenate(cols, axis=1).astype(jnp.float32)      # [2, E]


@functools.lru_cache(maxsize=None)
def _cached_spiral_points_t(points_per_class, num_classes, seed):
    # Spiral points are deterministic per (M, seed): compute once, keep on device.
    return jax.device_put(
        generate_spiral_data_t(points_per_class, num_classes,
                               jax.random.PRNGKey(seed)))


# ----------------------------------------------------------------------------
# In-kernel math: per-column min over the N latent codes of the pairwise
# squared distance.  z: [N, 2] (sublane axis), et: [2, T] (lane axis).
# ----------------------------------------------------------------------------
def _tile_mins(z, et):
    d0 = z[:, 0:1] - et[0:1, :]                     # [N, T]
    d1 = z[:, 1:2] - et[1:2, :]                     # [N, T]
    dist = d0 * d0 + d1 * d1                        # [N, T]
    return jnp.min(dist, axis=0, keepdims=True)     # [1, T]


# Gridless kernel: whole e fits one VMEM block; scalar loss -> SMEM.
def _latent_loss_single_kernel(z_ref, et_ref, out_ref, *, e_true):
    mins = _tile_mins(z_ref[...], et_ref[...])
    out_ref[0, 0] = jnp.sum(mins) / e_true


# Tiled kernel: E streamed along the "arbitrary" axis, split across the two
# TensorCores by the leading "parallel" axis.  Per-lane partial sums are
# accumulated into the resident output block; mask only where padding exists.
def _latent_loss_tiled_kernel(z_ref, et_ref, out_ref, *, e_true, tile_e,
                              tiles_per_core, num_tiles):
    c = pl.program_id(0)          # core / half-of-E index (parallel)
    i = pl.program_id(1)          # tile index within the half (arbitrary)

    @pl.when(i == 0)
    def _init():
        out_ref[...] = jnp.zeros_like(out_ref)

    mins = _tile_mins(z_ref[...], et_ref[...])[None]     # [1, 1, tile_e]
    g = c * tiles_per_core + i                            # global tile index
    n_full = e_true // tile_e                              # static

    if n_full >= num_tiles:
        # No tile contains padded columns: never mask.
        out_ref[...] += mins
    else:
        @pl.when(g < n_full)
        def _plain():
            out_ref[...] += mins

        @pl.when(g >= n_full)
        def _masked():  # only the tile(s) that actually contain padding
            col = jax.lax.broadcasted_iota(jnp.int32, mins.shape, 2) + g * tile_e
            out_ref[...] += jnp.where(col < e_true, mins, 0.0)


def latent_lse_loss(z, e_t):
    """z: [N, 2] f32, e_t: [2, E] f32 -> scalar f32 loss."""
    n = z.shape[0]
    e_true = e_t.shape[1]
    assert z.shape[1] == 2 and e_t.shape[0] == 2, "spiral data is 2-D"
    z = z.astype(jnp.float32)
    e_t = e_t.astype(jnp.float32)

    tile_cap = _tile_cap(n)
    e_pad128 = _round_up(e_true, LANE)

    if e_pad128 <= tile_cap:
        # Single gridless call: no pad, no mask, no grid overhead.
        loss = pl.pallas_call(
            functools.partial(_latent_loss_single_kernel, e_true=e_true),
            out_shape=jax.ShapeDtypeStruct((1, 1), jnp.float32),
            out_specs=pl.BlockSpec(memory_space=pltpu.MemorySpace.SMEM),
        )(z, e_t)
        return loss[0, 0]

    # Large E: balanced tiling over an even number of tiles so each TensorCore
    # gets half; pad e only up to num_tiles * tile_e (at most ~one tile).
    num_tiles = _cdiv(e_pad128, tile_cap)
    if num_tiles % 2:
        num_tiles += 1
    tile_e = _round_up(_cdiv(e_pad128, num_tiles), LANE)
    tiles_per_core = num_tiles // 2
    total_cols = num_tiles * tile_e
    et_p = jnp.pad(e_t, ((0, 0), (0, total_cols - e_true)))

    partial = pl.pallas_call(
        functools.partial(_latent_loss_tiled_kernel, e_true=e_true,
                          tile_e=tile_e, tiles_per_core=tiles_per_core,
                          num_tiles=num_tiles),
        out_shape=jax.ShapeDtypeStruct((2, 1, tile_e), jnp.float32),
        grid=(2, tiles_per_core),
        in_specs=[
            pl.BlockSpec((n, 2), lambda c, i: (0, 0)),                # z resident
            pl.BlockSpec((2, tile_e),
                         lambda c, i: (0, c * tiles_per_core + i)),   # e stream
        ],
        out_specs=pl.BlockSpec((1, 1, tile_e), lambda c, i: (c, 0, 0)),
        compiler_params=pltpu.CompilerParams(
            dimension_semantics=("parallel", "arbitrary")),
    )(z, et_p)

    # Single cross-lane reduce + divide, once per call (tiny XLA epilogue).
    return jnp.sum(partial) / e_true


# Module-level jit: no per-forward re-trace / wrapper rebuild.
_latent_lse_loss = jax.jit(latent_lse_loss)


# ----------------------------------------------------------------------------
# Module-equivalent wrapper (mirrors LatentLayer.forward).
# ----------------------------------------------------------------------------
def latent_layer_forward(data, *, M, spiral_seed=0):
    mean = data["z"]                                           # [N, z_dim(=2)]
    e_t = _cached_spiral_points_t(M // 5, 5, spiral_seed)      # [2, (M//5)*5]
    data["lse_loss"] = _latent_lse_loss(mean, e_t)
    return data


def _reference_loss(z, e_t):
    dist = jnp.sum((z[:, :, None] - e_t[None, :, :]) ** 2, axis=1)   # [N, E]
    return jnp.mean(jnp.min(dist, axis=0))


if __name__ == "__main__":
    key = jax.random.PRNGKey(0)
    k_z, _ = jax.random.split(key)

    N = 8          # number of latent codes
    Z_DIM = 2      # spiral data is 2-D, so z must be 2-D
    M = 40         # -> E = (M // 5) * 5 = 40 spiral points (gridless path)

    z = jax.random.normal(k_z, (N, Z_DIM), dtype=jnp.float32)
    data = {"z": z}

    out = latent_layer_forward(data, M=M, spiral_seed=0)
    loss = jax.block_until_ready(out["lse_loss"])

    e_t_small = _cached_spiral_points_t(M // 5, 5, 0)
    ref_small = _reference_loss(z, e_t_small)
    assert jnp.allclose(loss, ref_small, rtol=1e-5, atol=1e-6), (loss, ref_small)

    # Exercise the tiled / dual-core path: E = 100000 -> grid (2, 2) @ 25088 lanes.
    M_big = 100000
    e_t_big = _cached_spiral_points_t(M_big // 5, 5, 0)
    loss_big = jax.block_until_ready(_latent_lse_loss(z, e_t_big))
    ref_big = _reference_loss(z, e_t_big)
    assert jnp.allclose(loss_big, ref_big, rtol=1e-4, atol=1e-6), (loss_big, ref_big)

    print("KERNEL_OK")
</pallas_src>

<mosaic_0001>
module attributes {stable_mosaic.version = 11 : i64} {
  func.func @_latent_loss_single_kernel(%arg0: memref<8x2xf32, #tpu.memory_space<vmem>>, %arg1: memref<2x40xf32, #tpu.memory_space<vmem>>, %arg2: memref<1x1xf32, #tpu.memory_space<smem>>) attributes {dimension_semantics = [], scalar_prefetch = 0 : i64, scratch_operands = 0 : i64, tpu.core_type = #tpu.core_type<tc>} {
    %c0 = arith.constant 0 : index
    %c0_0 = arith.constant 0 : index
    %0 = vector.load %arg0[%c0, %c0_0] : memref<8x2xf32, #tpu.memory_space<vmem>>, vector<8x2xf32>
    %c0_1 = arith.constant 0 : index
    %c0_2 = arith.constant 0 : index
    %1 = vector.load %arg1[%c0_1, %c0_2] : memref<2x40xf32, #tpu.memory_space<vmem>>, vector<2x40xf32>
    %2 = vector.extract_strided_slice %0 {offsets = [0, 0], sizes = [8, 1], strides = [1, 1]} : vector<8x2xf32> to vector<8x1xf32>
    %3 = vector.extract_strided_slice %1 {offsets = [0, 0], sizes = [1, 40], strides = [1, 1]} : vector<2x40xf32> to vector<1x40xf32>
    %4 = vector.broadcast %2 : vector<8x1xf32> to vector<8x40xf32>
    %5 = vector.broadcast %3 : vector<1x40xf32> to vector<8x40xf32>
    %6 = arith.subf %4, %5 : vector<8x40xf32>
    %7 = vector.extract_strided_slice %0 {offsets = [0, 1], sizes = [8, 1], strides = [1, 1]} : vector<8x2xf32> to vector<8x1xf32>
    %8 = vector.extract_strided_slice %1 {offsets = [1, 0], sizes = [1, 40], strides = [1, 1]} : vector<2x40xf32> to vector<1x40xf32>
    %9 = vector.broadcast %7 : vector<8x1xf32> to vector<8x40xf32>
    %10 = vector.broadcast %8 : vector<1x40xf32> to vector<8x40xf32>
    %11 = arith.subf %9, %10 : vector<8x40xf32>
    %12 = arith.mulf %6, %6 : vector<8x40xf32>
    %13 = arith.mulf %11, %11 : vector<8x40xf32>
    %14 = arith.addf %12, %13 : vector<8x40xf32>
    %cst = arith.constant dense<0x7F800000> : vector<40xf32>
    %15 = vector.multi_reduction <minimumf>, %14, %cst [0] : vector<8x40xf32> to vector<40xf32>
    %16 = vector.shape_cast %15 : vector<40xf32> to vector<1x40xf32>
    %17 = vector.shape_cast %16 : vector<1x40xf32> to vector<1x1x40xf32>
    %cst_3 = arith.constant dense<0.000000e+00> : vector<1xf32>
    %18 = vector.multi_reduction <add>, %17, %cst_3 [1, 2] : vector<1x1x40xf32> to vector<1xf32>
    %19 = vector.shape_cast %18 : vector<1xf32> to vector<1x1x1xf32>
    %20 = vector.extract %19[0, 0, 0] : f32 from vector<1x1x1xf32>
    %cst_4 = arith.constant 4.000000e+01 : f32
    %21 = arith.divf %20, %cst_4 : f32
    %c0_5 = arith.constant 0 : index
    %c0_6 = arith.constant 0 : index
    %22 = memref.load %arg2[%c0_5, %c0_6] : memref<1x1xf32, #tpu.memory_space<smem>>
    memref.store %21, %arg2[%c0_5, %c0_6] : memref<1x1xf32, #tpu.memory_space<smem>>
    return
  }
}

</mosaic_0001>

<bundles_post_ra>
// kernel: latent_lse_loss.1
= control target key start
LH: loop header
LB: loop body
LE: loop exit
PB: predicated region body
PF: predicated region fallthrough
CT: control target
= control target key end

     0   :  { %v101_v1 = vmov 0   ;;  %s129_s0 = inlined_call_operand.vmem [shape: f32[8,2], index: 0, kind: input, shape index: {}]   ;;  %s130_s1 = inlined_call_operand.vmem [shape: f32[2,40], index: 1, kind: input, shape index: {}]   ;;  %s131_s2 = inlined_call_operand.hbm [shape: f32[1,1], index: 2, kind: output, shape index: {}]  }
   0x1   :  { %v12_v0 = vld [vmem:[%s129_s0] sm:$0xff]  ;;  %83 = vset.pattern.permute.xlu0 %v101_v1 }
   0x2   :  { %7 = vsyncpa [#allocation3], 0  ;;  %16 = vperm.xlu0 %83, %v12_v0   ;;  %v102_v2 = vmov 1   ;;  %v13_v4 = vld [vmem:[%s130_s1] sm:$0x3]  ;;  %vm30_vm0 = vcmask 326656  }
   0x3   :  { %v19_v5 = vperm.slane %v13_v4, 0  ;;  %v25_v6 = vperm.slane %v13_v4, 1  ;;  %vm38_vm1 = vcmask 319488   ;;  %v103_v21 = vmov 40.0   ;;  %s65_s13 = sshll.u32 %s131_s2, 4  ;;  %s104_s17 = smov [#allocation2]   ;;  %s66_s13 = int_to_ptr.hbm [resolvable:$true] %s65_s13 }
   0x4   :  { %85 = vrcp.f32 %v103_v21 }
   0xa   :  { %84 = vset.pattern.permute.xlu0 %v102_v2  ;;  %v86_v22 = vpop.eup %85 }
   0xb   :  { %22 = vperm.xlu0 %84, %v12_v0   ;;  %v50_v23 = vmul.f32 40.0, %v86_v22  ;;  %vm54_vm2 = vweird.f32 %v86_v22 }
   0xd   :  { %v51_v24 = vsub.f32 1.0, %v50_v23 }
   0xf   :  { %v52_v28 = vmul.f32 %v86_v22, %v51_v24 }
  0x11   :  { %v53_v31 = vadd.f32 %v86_v22, %v52_v28 }
  0x13   :  { %v55_v34 = vsel %vm54_vm2, %v86_v22, %v53_v31 }
  0x74   :  { %v17_v3 = vpop.permute.xlu0 %16 }
  0x75   :  { %v20_v7 = vsub.f32 %v17_v3, %v19_v5 }
  0x77   :  { %v27_v10 = vmul.f32 %v20_v7, %v20_v7 }
  0x7d   :  { %v23_v8 = vpop.permute.xlu0 %22 }
  0x7e   :  { %v26_v9 = vsub.f32 %v23_v8, %v25_v6 }
  0x80   :  { %v28_v11 = vmul.f32 %v26_v9, %v26_v9 }
  0x82   :  { %v29_v12 = vadd.f32 %v28_v11, %v27_v10 }
  0x84   :  { %v31_v13 = vsel %vm30_vm0, %v29_v12, inf }
  0x85   :  { %v32_v14 = vrot.slane %v31_v13, 4 }
  0x87   :  { %v33_v15 = vmin.f32 %v31_v13, %v32_v14 }
  0x89   :  { %v34_v16 = vrot.slane %v33_v15, 2 }
  0x8b   :  { %v35_v17 = vmin.f32 %v33_v15, %v34_v16 }
  0x8d   :  { %v36_v18 = vrot.slane %v35_v17, 1 }
  0x8f   :  { %v37_v19 = vmin.f32 %v35_v17, %v36_v18 }
  0x91   :  { %v39_v20 = vsel %vm38_vm1, %v37_v19, 0.0 }
  0x92   :  { %40 = vadd.xlane.f32.xlu1 %v39_v20 }
 0x105   :  { %v41_v25 = vpop.xlane.xlu1 %40 }
 0x106   :  { %v42_v26 = vrot.slane %v41_v25, 4 }
 0x108   :  { %v43_v27 = vadd.f32 %v42_v26, %v41_v25 }
 0x10a   :  { %v44_v29 = vrot.slane %v43_v27, 2 }
 0x10c   :  { %v45_v30 = vadd.f32 %v44_v29, %v43_v27 }
 0x10e   :  { %v46_v32 = vrot.slane %v45_v30, 1 }
 0x110   :  { %v47_v33 = vadd.f32 %v46_v32, %v45_v30 }
 0x112   :  { %75 = vpush %v47_v33 }
 0x113   :  { %77 = vpush %v55_v34 }
 0x143   :  { %s76_s14 = spop %75 }
 0x144   :  { %s78_s15 = spop %77 }
 0x145   :  { %s57_s16 = smul.f32 %s78_s15, %s76_s14 }
 0x147   :  { %59 = sst [smem:[#allocation2]] %s57_s16 }
 0x148   :  { %68 = dma.smem_to_hbm %s104_s17, 16, %s66_s13, [#allocation3]  }
 0x149   :  { %99 = dma.done.wait [#allocation3], 16  }
 0x14a   :  { %100 = vsyncadd [#allocation3], 4294967280 }
 0x14b   :  { %73 = sfence }
 0x14c   :  { %74 = vsyncpa [#allocation3], 1 }

</bundles_post_ra>
